<compile_context>
chip_gen: v5e
topology: v5e:2x2
jax: 0.10.0
libtpu: 0.0.40
codegen_flags: <defaults>
</compile_context>

<pallas_src>
import jax
import jax.numpy as jnp
from jax import lax
from jax.experimental import pallas as pl
from jax.experimental.pallas import tpu as pltpu

# Synthetic "args" / vocab (small, TPU-friendly sizes)
VOCAB = 50      # len(vocab.word2id)
NI    = 32      # args.ni       (embedding dim)
NH    = 32      # args.enc_nh   (LSTM hidden size)
NZ    = 16      # args.nz
BATCH = 4
SEQ   = 8
B_PAD = 8                   # pad batch to the f32 sublane minimum
NG    = 4 * NH              # 128 gate lanes
NOUT  = 2 * NZ + NH         # useful output lanes: [mean | logvar | h_last] = 64
NOUT_PAD  = 128             # lane-dense output width (unmasked stores)
VOCAB_PAD = 128             # one-hot contraction dim padded to a full lane width

# v6e/v7x knob: jnp.bfloat16 cuts the per-step MXU latency on the serial h->h chain;
# keep f32 (default) for exact 1e-5 agreement with the reference.
RECUR_MATMUL_DTYPE = jnp.float32


def vae_encoder_kernel(tok_ref, eg_ref, whh_ref, wout_ref, out_ref):
    """LSTM forward with fused embedding/input-gates and packed output head.

    tok_ref:  (SEQ*B_PAD, 1) int32   time-major token ids (padded batch rows = 0)
    eg_ref:   (VOCAB_PAD, 4*NH) f32  embed @ W_ih^T + b_ih + b_hh (g-cols pre-scaled x2)
    whh_ref:  (NH, 4*NH)             W_hh^T                       (g-cols pre-scaled x2)
    wout_ref: (NH, NOUT_PAD) f32     [W_lin^T | I_NH | 0]
    out_ref:  (B_PAD, NOUT_PAD) f32  [mean | logvar | h_last | 0]
    """
    n_rows = tok_ref.shape[0]
    T = n_rows // B_PAD
    nh = whh_ref.shape[0]

    # Fused embedding lookup + x @ W_ih^T + bias: one-hot(token) @ embed_gates.
    tok = tok_ref[...]                                               # (64, 1) i32
    lane = lax.broadcasted_iota(jnp.int32, (n_rows, VOCAB_PAD), 1)   # (64, 128)
    onehot = (lane == tok).astype(jnp.float32)                       # (64, 128)
    gin = jnp.dot(onehot, eg_ref[...],
                  preferred_element_type=jnp.float32)                # (64, 4NH) in vregs

    whh = whh_ref[...]
    h = jnp.zeros((B_PAD, nh), jnp.float32)
    c = jnp.zeros((B_PAD, nh), jnp.float32)

    # T is a compile-time constant (8): fully unrolled; h/c stay in vregs.
    for t in range(T):
        gates = gin[t * B_PAD:(t + 1) * B_PAD, :] + jnp.dot(
            h.astype(whh.dtype), whh, preferred_element_type=jnp.float32)   # (8, 4NH)
        sig = jax.nn.sigmoid(gates)                   # single EUP pass on the full tile
        i = sig[:, 0 * nh:1 * nh]
        f = sig[:, 1 * nh:2 * nh]
        g = 2.0 * sig[:, 2 * nh:3 * nh] - 1.0         # tanh(x) = 2*sigmoid(2x) - 1
        o = sig[:, 3 * nh:4 * nh]
        c = f * c + i * g
        h = o * jnp.tanh(c)

    # Lane-packed head: h @ [W_lin^T | I | 0] -> [mean | logvar | h_last | 0].
    out_ref[...] = jnp.dot(h, wout_ref[...], preferred_element_type=jnp.float32)


def init_params(key):
    """Deterministic synthetic parameters (PyTorch-layout shapes)."""
    ks = jax.random.split(key, 6)
    uni = lambda k, shape, s: jax.random.uniform(k, shape, jnp.float32, -s, s)
    return {
        "embed": uni(ks[0], (VOCAB, NI), 0.01),        # emb_init-style
        "w_ih":  uni(ks[1], (4 * NH, NI), 0.1),        # nn.LSTM weight_ih_l0
        "w_hh":  uni(ks[2], (4 * NH, NH), 0.1),        # nn.LSTM weight_hh_l0
        "b_ih":  uni(ks[3], (4 * NH,), 0.1),
        "b_hh":  uni(ks[4], (4 * NH,), 0.1),
        "w_lin": uni(ks[5], (2 * NZ, NH), 0.1),        # nn.Linear(nh, 2*nz, bias=False)
    }


def prepare_kernel_params(params):
    """One-time layout plumbing (host side, not per call)."""
    bias = params["b_ih"] + params["b_hh"]                             # (4NH,)
    eg = params["embed"] @ params["w_ih"].T + bias[None, :]            # (VOCAB, 4NH)
    whh_t = params["w_hh"].T                                           # (NH, 4NH)

    # tanh-from-sigmoid rewrite: scale ALL g-gate pre-activation contributions by 2
    # (input-side eg columns AND recurrent whh columns; bias is already inside eg).
    scale = jnp.ones((4 * NH,), jnp.float32).at[2 * NH:3 * NH].set(2.0)
    eg = eg * scale[None, :]
    whh_t = whh_t * scale[None, :]

    eg_pad = jnp.zeros((VOCAB_PAD, 4 * NH), jnp.float32).at[:VOCAB, :].set(eg)

    w_out = jnp.zeros((NH, NOUT_PAD), jnp.float32)
    w_out = w_out.at[:, :2 * NZ].set(params["w_lin"].T)
    w_out = w_out.at[:, 2 * NZ:2 * NZ + NH].set(jnp.eye(NH, dtype=jnp.float32))

    return {
        "eg":    eg_pad,
        "whh_t": whh_t.astype(RECUR_MATMUL_DTYPE),
        "w_out": w_out,
    }


@jax.jit
def vae_encoder_forward(tokens, kp):
    # Only residual wrapper work: a 256-byte int32 index prep (time-major, batch
    # padded 4 -> 8, column layout). enc_dropout_in = 0 -> nn.Dropout is identity.
    tok_tm = jnp.zeros((SEQ, B_PAD), jnp.int32).at[:, :BATCH].set(tokens.T)
    tok_col = tok_tm.reshape(SEQ * B_PAD, 1)

    out = pl.pallas_call(
        vae_encoder_kernel,
        out_shape=jax.ShapeDtypeStruct((B_PAD, NOUT_PAD), jnp.float32),
        in_specs=[pl.BlockSpec(memory_space=pltpu.MemorySpace.VMEM)] * 4,
        out_specs=pl.BlockSpec(memory_space=pltpu.MemorySpace.VMEM),
    )(tok_col, kp["eg"], kp["whh_t"], kp["w_out"])

    out = out[:BATCH, :NOUT]          # drop batch padding + lane padding
    mean = out[:, :NZ]
    logvar = out[:, NZ:2 * NZ]
    h_last = out[:, 2 * NZ:]
    # PyTorch: last_state (1, B, NH).permute(1, 0, 2) -> (B, 1, NH);
    # mean/logvar are squeeze(0)-ed to (B, NZ).
    return mean, logvar, h_last.reshape(BATCH, 1, NH)


def reference_forward(tokens, params):
    """Pure-JAX reference mirroring the PyTorch forward."""
    emb = params["embed"][tokens]                      # (B, T, NI)

    def cell(carry, x_t):
        h, c = carry
        gates = (x_t @ params["w_ih"].T + h @ params["w_hh"].T
                 + params["b_ih"] + params["b_hh"])
        i, f, g, o = jnp.split(gates, 4, axis=-1)
        c = jax.nn.sigmoid(f) * c + jax.nn.sigmoid(i) * jnp.tanh(g)
        h = jax.nn.sigmoid(o) * jnp.tanh(c)
        return (h, c), None

    h0 = jnp.zeros((BATCH, NH), jnp.float32)
    c0 = jnp.zeros((BATCH, NH), jnp.float32)
    (h, _), _ = lax.scan(cell, (h0, c0), jnp.transpose(emb, (1, 0, 2)))
    proj = h @ params["w_lin"].T
    return proj[:, :NZ], proj[:, NZ:], h.reshape(BATCH, 1, NH)


if __name__ == "__main__":
    key = jax.random.PRNGKey(0)
    k_tok, k_param = jax.random.split(key)
    tokens = jax.random.randint(k_tok, (BATCH, SEQ), 0, VOCAB, dtype=jnp.int32)
    params = init_params(k_param)
    kparams = prepare_kernel_params(params)   # one-time layout prep (not per-call)

    mean, logvar, last_state = jax.block_until_ready(
        vae_encoder_forward(tokens, kparams))

    r_mean, r_logvar, r_last = reference_forward(tokens, params)
    assert mean.shape == (BATCH, NZ)
    assert logvar.shape == (BATCH, NZ)
    assert last_state.shape == (BATCH, 1, NH)

    tol = 1e-5 if RECUR_MATMUL_DTYPE == jnp.float32 else 2e-3
    assert jnp.allclose(mean, r_mean, atol=tol, rtol=tol)
    assert jnp.allclose(logvar, r_logvar, atol=tol, rtol=tol)
    assert jnp.allclose(last_state, r_last, atol=tol, rtol=tol)

    print("KERNEL_OK")
</pallas_src>

<mosaic_0001>
module attributes {stable_mosaic.version = 11 : i64} {
  func.func @vae_encoder_kernel(%arg0: memref<64x1xi32, #tpu.memory_space<vmem>>, %arg1: memref<128x128xf32, #tpu.memory_space<vmem>>, %arg2: memref<32x128xf32, #tpu.memory_space<vmem>>, %arg3: memref<32x128xf32, #tpu.memory_space<vmem>>, %arg4: memref<8x128xf32, #tpu.memory_space<vmem>>) attributes {dimension_semantics = [], scalar_prefetch = 0 : i64, scratch_operands = 0 : i64, tpu.core_type = #tpu.core_type<tc>} {
    %c0 = arith.constant 0 : index
    %c0_0 = arith.constant 0 : index
    %0 = vector.load %arg0[%c0, %c0_0] : memref<64x1xi32, #tpu.memory_space<vmem>>, vector<64x1xi32>
    %1 = tpu.iota {dimensions = array<i32: 1>} : vector<64x128xi32>
    %2 = vector.broadcast %0 : vector<64x1xi32> to vector<64x128xi32>
    %3 = arith.cmpi eq, %1, %2 : vector<64x128xi32>
    %4 = arith.extui %3 : vector<64x128xi1> to vector<64x128xi32>
    %5 = arith.sitofp %4 : vector<64x128xi32> to vector<64x128xf32>
    %c0_1 = arith.constant 0 : index
    %c0_2 = arith.constant 0 : index
    %6 = vector.load %arg1[%c0_1, %c0_2] : memref<128x128xf32, #tpu.memory_space<vmem>>, vector<128x128xf32>
    %cst = arith.constant dense<0.000000e+00> : vector<64x128xf32>
    %7 = tpu.matmul %5, %6, %cst {dimension_numbers = #tpu.dot_dimension_numbers<[1], [0], [0], [1], [0, 0, 1, 1], [], []>} : vector<64x128xf32>, vector<128x128xf32>, vector<64x128xf32> -> vector<64x128xf32>
    %c0_3 = arith.constant 0 : index
    %c0_4 = arith.constant 0 : index
    %8 = vector.load %arg2[%c0_3, %c0_4] : memref<32x128xf32, #tpu.memory_space<vmem>>, vector<32x128xf32>
    %cst_5 = arith.constant 0.000000e+00 : f32
    %9 = vector.broadcast %cst_5 : f32 to vector<8x32xf32>
    %cst_6 = arith.constant 0.000000e+00 : f32
    %10 = vector.broadcast %cst_6 : f32 to vector<8x32xf32>
    %11 = vector.extract_strided_slice %7 {offsets = [0, 0], sizes = [8, 128], strides = [1, 1]} : vector<64x128xf32> to vector<8x128xf32>
    %cst_7 = arith.constant dense<0.000000e+00> : vector<8x128xf32>
    %12 = tpu.matmul %9, %8, %cst_7 {dimension_numbers = #tpu.dot_dimension_numbers<[1], [0], [0], [1], [0, 0, 1, 1], [], []>} : vector<8x32xf32>, vector<32x128xf32>, vector<8x128xf32> -> vector<8x128xf32>
    %13 = arith.addf %11, %12 : vector<8x128xf32>
    %14 = arith.negf %13 : vector<8x128xf32>
    %15 = math.exp %14 : vector<8x128xf32>
    %cst_8 = arith.constant 1.000000e+00 : f32
    %16 = vector.broadcast %cst_8 : f32 to vector<8x128xf32>
    %17 = arith.addf %16, %15 : vector<8x128xf32>
    %18 = arith.divf %16, %17 : vector<8x128xf32>
    %19 = vector.extract_strided_slice %18 {offsets = [0, 0], sizes = [8, 32], strides = [1, 1]} : vector<8x128xf32> to vector<8x32xf32>
    %20 = vector.extract_strided_slice %18 {offsets = [0, 32], sizes = [8, 32], strides = [1, 1]} : vector<8x128xf32> to vector<8x32xf32>
    %21 = vector.extract_strided_slice %18 {offsets = [0, 64], sizes = [8, 32], strides = [1, 1]} : vector<8x128xf32> to vector<8x32xf32>
    %cst_9 = arith.constant 2.000000e+00 : f32
    %22 = vector.broadcast %cst_9 : f32 to vector<8x32xf32>
    %23 = arith.mulf %22, %21 : vector<8x32xf32>
    %cst_10 = arith.constant 1.000000e+00 : f32
    %24 = vector.broadcast %cst_10 : f32 to vector<8x32xf32>
    %25 = arith.subf %23, %24 : vector<8x32xf32>
    %26 = vector.extract_strided_slice %18 {offsets = [0, 96], sizes = [8, 32], strides = [1, 1]} : vector<8x128xf32> to vector<8x32xf32>
    %27 = arith.mulf %20, %10 : vector<8x32xf32>
    %28 = arith.mulf %19, %25 : vector<8x32xf32>
    %29 = arith.addf %27, %28 : vector<8x32xf32>
    %30 = math.tanh %29 : vector<8x32xf32>
    %31 = arith.mulf %26, %30 : vector<8x32xf32>
    %32 = vector.extract_strided_slice %7 {offsets = [8, 0], sizes = [8, 128], strides = [1, 1]} : vector<64x128xf32> to vector<8x128xf32>
    %cst_11 = arith.constant dense<0.000000e+00> : vector<8x128xf32>
    %33 = tpu.matmul %31, %8, %cst_11 {dimension_numbers = #tpu.dot_dimension_numbers<[1], [0], [0], [1], [0, 0, 1, 1], [], []>} : vector<8x32xf32>, vector<32x128xf32>, vector<8x128xf32> -> vector<8x128xf32>
    %34 = arith.addf %32, %33 : vector<8x128xf32>
    %35 = arith.negf %34 : vector<8x128xf32>
    %36 = math.exp %35 : vector<8x128xf32>
    %cst_12 = arith.constant 1.000000e+00 : f32
    %37 = vector.broadcast %cst_12 : f32 to vector<8x128xf32>
    %38 = arith.addf %37, %36 : vector<8x128xf32>
    %39 = arith.divf %37, %38 : vector<8x128xf32>
    %40 = vector.extract_strided_slice %39 {offsets = [0, 0], sizes = [8, 32], strides = [1, 1]} : vector<8x128xf32> to vector<8x32xf32>
    %41 = vector.extract_strided_slice %39 {offsets = [0, 32], sizes = [8, 32], strides = [1, 1]} : vector<8x128xf32> to vector<8x32xf32>
    %42 = vector.extract_strided_slice %39 {offsets = [0, 64], sizes = [8, 32], strides = [1, 1]} : vector<8x128xf32> to vector<8x32xf32>
    %cst_13 = arith.constant 2.000000e+00 : f32
    %43 = vector.broadcast %cst_13 : f32 to vector<8x32xf32>
    %44 = arith.mulf %43, %42 : vector<8x32xf32>
    %cst_14 = arith.constant 1.000000e+00 : f32
    %45 = vector.broadcast %cst_14 : f32 to vector<8x32xf32>
    %46 = arith.subf %44, %45 : vector<8x32xf32>
    %47 = vector.extract_strided_slice %39 {offsets = [0, 96], sizes = [8, 32], strides = [1, 1]} : vector<8x128xf32> to vector<8x32xf32>
    %48 = arith.mulf %41, %29 : vector<8x32xf32>
    %49 = arith.mulf %40, %46 : vector<8x32xf32>
    %50 = arith.addf %48, %49 : vector<8x32xf32>
    %51 = math.tanh %50 : vector<8x32xf32>
    %52 = arith.mulf %47, %51 : vector<8x32xf32>
    %53 = vector.extract_strided_slice %7 {offsets = [16, 0], sizes = [8, 128], strides = [1, 1]} : vector<64x128xf32> to vector<8x128xf32>
    %cst_15 = arith.constant dense<0.000000e+00> : vector<8x128xf32>
    %54 = tpu.matmul %52, %8, %cst_15 {dimension_numbers = #tpu.dot_dimension_numbers<[1], [0], [0], [1], [0, 0, 1, 1], [], []>} : vector<8x32xf32>, vector<32x128xf32>, vector<8x128xf32> -> vector<8x128xf32>
    %55 = arith.addf %53, %54 : vector<8x128xf32>
    %56 = arith.negf %55 : vector<8x128xf32>
    %57 = math.exp %56 : vector<8x128xf32>
    %cst_16 = arith.constant 1.000000e+00 : f32
    %58 = vector.broadcast %cst_16 : f32 to vector<8x128xf32>
    %59 = arith.addf %58, %57 : vector<8x128xf32>
    %60 = arith.divf %58, %59 : vector<8x128xf32>
    %61 = vector.extract_strided_slice %60 {offsets = [0, 0], sizes = [8, 32], strides = [1, 1]} : vector<8x128xf32> to vector<8x32xf32>
    %62 = vector.extract_strided_slice %60 {offsets = [0, 32], sizes = [8, 32], strides = [1, 1]} : vector<8x128xf32> to vector<8x32xf32>
    %63 = vector.extract_strided_slice %60 {offsets = [0, 64], sizes = [8, 32], strides = [1, 1]} : vector<8x128xf32> to vector<8x32xf32>
    %cst_17 = arith.constant 2.000000e+00 : f32
    %64 = vector.broadcast %cst_17 : f32 to vector<8x32xf32>
    %65 = arith.mulf %64, %63 : vector<8x32xf32>
    %cst_18 = arith.constant 1.000000e+00 : f32
    %66 = vector.broadcast %cst_18 : f32 to vector<8x32xf32>
    %67 = arith.subf %65, %66 : vector<8x32xf32>
    %68 = vector.extract_strided_slice %60 {offsets = [0, 96], sizes = [8, 32], strides = [1, 1]} : vector<8x128xf32> to vector<8x32xf32>
    %69 = arith.mulf %62, %50 : vector<8x32xf32>
    %70 = arith.mulf %61, %67 : vector<8x32xf32>
    %71 = arith.addf %69, %70 : vector<8x32xf32>
    %72 = math.tanh %71 : vector<8x32xf32>
    %73 = arith.mulf %68, %72 : vector<8x32xf32>
    %74 = vector.extract_strided_slice %7 {offsets = [24, 0], sizes = [8, 128], strides = [1, 1]} : vector<64x128xf32> to vector<8x128xf32>
    %cst_19 = arith.constant dense<0.000000e+00> : vector<8x128xf32>
    %75 = tpu.matmul %73, %8, %cst_19 {dimension_numbers = #tpu.dot_dimension_numbers<[1], [0], [0], [1], [0, 0, 1, 1], [], []>} : vector<8x32xf32>, vector<32x128xf32>, vector<8x128xf32> -> vector<8x128xf32>
    %76 = arith.addf %74, %75 : vector<8x128xf32>
    %77 = arith.negf %76 : vector<8x128xf32>
    %78 = math.exp %77 : vector<8x128xf32>
    %cst_20 = arith.constant 1.000000e+00 : f32
    %79 = vector.broadcast %cst_20 : f32 to vector<8x128xf32>
    %80 = arith.addf %79, %78 : vector<8x128xf32>
    %81 = arith.divf %79, %80 : vector<8x128xf32>
    %82 = vector.extract_strided_slice %81 {offsets = [0, 0], sizes = [8, 32], strides = [1, 1]} : vector<8x128xf32> to vector<8x32xf32>
    %83 = vector.extract_strided_slice %81 {offsets = [0, 32], sizes = [8, 32], strides = [1, 1]} : vector<8x128xf32> to vector<8x32xf32>
    %84 = vector.extract_strided_slice %81 {offsets = [0, 64], sizes = [8, 32], strides = [1, 1]} : vector<8x128xf32> to vector<8x32xf32>
    %cst_21 = arith.constant 2.000000e+00 : f32
    %85 = vector.broadcast %cst_21 : f32 to vector<8x32xf32>
    %86 = arith.mulf %85, %84 : vector<8x32xf32>
    %cst_22 = arith.constant 1.000000e+00 : f32
    %87 = vector.broadcast %cst_22 : f32 to vector<8x32xf32>
    %88 = arith.subf %86, %87 : vector<8x32xf32>
    %89 = vector.extract_strided_slice %81 {offsets = [0, 96], sizes = [8, 32], strides = [1, 1]} : vector<8x128xf32> to vector<8x32xf32>
    %90 = arith.mulf %83, %71 : vector<8x32xf32>
    %91 = arith.mulf %82, %88 : vector<8x32xf32>
    %92 = arith.addf %90, %91 : vector<8x32xf32>
    %93 = math.tanh %92 : vector<8x32xf32>
    %94 = arith.mulf %89, %93 : vector<8x32xf32>
    %95 = vector.extract_strided_slice %7 {offsets = [32, 0], sizes = [8, 128], strides = [1, 1]} : vector<64x128xf32> to vector<8x128xf32>
    %cst_23 = arith.constant dense<0.000000e+00> : vector<8x128xf32>
    %96 = tpu.matmul %94, %8, %cst_23 {dimension_numbers = #tpu.dot_dimension_numbers<[1], [0], [0], [1], [0, 0, 1, 1], [], []>} : vector<8x32xf32>, vector<32x128xf32>, vector<8x128xf32> -> vector<8x128xf32>
    %97 = arith.addf %95, %96 : vector<8x128xf32>
    %98 = arith.negf %97 : vector<8x128xf32>
    %99 = math.exp %98 : vector<8x128xf32>
    %cst_24 = arith.constant 1.000000e+00 : f32
    %100 = vector.broadcast %cst_24 : f32 to vector<8x128xf32>
    %101 = arith.addf %100, %99 : vector<8x128xf32>
    %102 = arith.divf %100, %101 : vector<8x128xf32>
    %103 = vector.extract_strided_slice %102 {offsets = [0, 0], sizes = [8, 32], strides = [1, 1]} : vector<8x128xf32> to vector<8x32xf32>
    %104 = vector.extract_strided_slice %102 {offsets = [0, 32], sizes = [8, 32], strides = [1, 1]} : vector<8x128xf32> to vector<8x32xf32>
    %105 = vector.extract_strided_slice %102 {offsets = [0, 64], sizes = [8, 32], strides = [1, 1]} : vector<8x128xf32> to vector<8x32xf32>
    %cst_25 = arith.constant 2.000000e+00 : f32
    %106 = vector.broadcast %cst_25 : f32 to vector<8x32xf32>
    %107 = arith.mulf %106, %105 : vector<8x32xf32>
    %cst_26 = arith.constant 1.000000e+00 : f32
    %108 = vector.broadcast %cst_26 : f32 to vector<8x32xf32>
    %109 = arith.subf %107, %108 : vector<8x32xf32>
    %110 = vector.extract_strided_slice %102 {offsets = [0, 96], sizes = [8, 32], strides = [1, 1]} : vector<8x128xf32> to vector<8x32xf32>
    %111 = arith.mulf %104, %92 : vector<8x32xf32>
    %112 = arith.mulf %103, %109 : vector<8x32xf32>
    %113 = arith.addf %111, %112 : vector<8x32xf32>
    %114 = math.tanh %113 : vector<8x32xf32>
    %115 = arith.mulf %110, %114 : vector<8x32xf32>
    %116 = vector.extract_strided_slice %7 {offsets = [40, 0], sizes = [8, 128], strides = [1, 1]} : vector<64x128xf32> to vector<8x128xf32>
    %cst_27 = arith.constant dense<0.000000e+00> : vector<8x128xf32>
    %117 = tpu.matmul %115, %8, %cst_27 {dimension_numbers = #tpu.dot_dimension_numbers<[1], [0], [0], [1], [0, 0, 1, 1], [], []>} : vector<8x32xf32>, vector<32x128xf32>, vector<8x128xf32> -> vector<8x128xf32>
    %118 = arith.addf %116, %117 : vector<8x128xf32>
    %119 = arith.negf %118 : vector<8x128xf32>
    %120 = math.exp %119 : vector<8x128xf32>
    %cst_28 = arith.constant 1.000000e+00 : f32
    %121 = vector.broadcast %cst_28 : f32 to vector<8x128xf32>
    %122 = arith.addf %121, %120 : vector<8x128xf32>
    %123 = arith.divf %121, %122 : vector<8x128xf32>
    %124 = vector.extract_strided_slice %123 {offsets = [0, 0], sizes = [8, 32], strides = [1, 1]} : vector<8x128xf32> to vector<8x32xf32>
    %125 = vector.extract_strided_slice %123 {offsets = [0, 32], sizes = [8, 32], strides = [1, 1]} : vector<8x128xf32> to vector<8x32xf32>
    %126 = vector.extract_strided_slice %123 {offsets = [0, 64], sizes = [8, 32], strides = [1, 1]} : vector<8x128xf32> to vector<8x32xf32>
    %cst_29 = arith.constant 2.000000e+00 : f32
    %127 = vector.broadcast %cst_29 : f32 to vector<8x32xf32>
    %128 = arith.mulf %127, %126 : vector<8x32xf32>
    %cst_30 = arith.constant 1.000000e+00 : f32
    %129 = vector.broadcast %cst_30 : f32 to vector<8x32xf32>
    %130 = arith.subf %128, %129 : vector<8x32xf32>
    %131 = vector.extract_strided_slice %123 {offsets = [0, 96], sizes = [8, 32], strides = [1, 1]} : vector<8x128xf32> to vector<8x32xf32>
    %132 = arith.mulf %125, %113 : vector<8x32xf32>
    %133 = arith.mulf %124, %130 : vector<8x32xf32>
    %134 = arith.addf %132, %133 : vector<8x32xf32>
    %135 = math.tanh %134 : vector<8x32xf32>
    %136 = arith.mulf %131, %135 : vector<8x32xf32>
    %137 = vector.extract_strided_slice %7 {offsets = [48, 0], sizes = [8, 128], strides = [1, 1]} : vector<64x128xf32> to vector<8x128xf32>
    %cst_31 = arith.constant dense<0.000000e+00> : vector<8x128xf32>
    %138 = tpu.matmul %136, %8, %cst_31 {dimension_numbers = #tpu.dot_dimension_numbers<[1], [0], [0], [1], [0, 0, 1, 1], [], []>} : vector<8x32xf32>, vector<32x128xf32>, vector<8x128xf32> -> vector<8x128xf32>
    %139 = arith.addf %137, %138 : vector<8x128xf32>
    %140 = arith.negf %139 : vector<8x128xf32>
    %141 = math.exp %140 : vector<8x128xf32>
    %cst_32 = arith.constant 1.000000e+00 : f32
    %142 = vector.broadcast %cst_32 : f32 to vector<8x128xf32>
    %143 = arith.addf %142, %141 : vector<8x128xf32>
    %144 = arith.divf %142, %143 : vector<8x128xf32>
    %145 = vector.extract_strided_slice %144 {offsets = [0, 0], sizes = [8, 32], strides = [1, 1]} : vector<8x128xf32> to vector<8x32xf32>
    %146 = vector.extract_strided_slice %144 {offsets = [0, 32], sizes = [8, 32], strides = [1, 1]} : vector<8x128xf32> to vector<8x32xf32>
    %147 = vector.extract_strided_slice %144 {offsets = [0, 64], sizes = [8, 32], strides = [1, 1]} : vector<8x128xf32> to vector<8x32xf32>
    %cst_33 = arith.constant 2.000000e+00 : f32
    %148 = vector.broadcast %cst_33 : f32 to vector<8x32xf32>
    %149 = arith.mulf %148, %147 : vector<8x32xf32>
    %cst_34 = arith.constant 1.000000e+00 : f32
    %150 = vector.broadcast %cst_34 : f32 to vector<8x32xf32>
    %151 = arith.subf %149, %150 : vector<8x32xf32>
    %152 = vector.extract_strided_slice %144 {offsets = [0, 96], sizes = [8, 32], strides = [1, 1]} : vector<8x128xf32> to vector<8x32xf32>
    %153 = arith.mulf %146, %134 : vector<8x32xf32>
    %154 = arith.mulf %145, %151 : vector<8x32xf32>
    %155 = arith.addf %153, %154 : vector<8x32xf32>
    %156 = math.tanh %155 : vector<8x32xf32>
    %157 = arith.mulf %152, %156 : vector<8x32xf32>
    %158 = vector.extract_strided_slice %7 {offsets = [56, 0], sizes = [8, 128], strides = [1, 1]} : vector<64x128xf32> to vector<8x128xf32>
    %cst_35 = arith.constant dense<0.000000e+00> : vector<8x128xf32>
    %159 = tpu.matmul %157, %8, %cst_35 {dimension_numbers = #tpu.dot_dimension_numbers<[1], [0], [0], [1], [0, 0, 1, 1], [], []>} : vector<8x32xf32>, vector<32x128xf32>, vector<8x128xf32> -> vector<8x128xf32>
    %160 = arith.addf %158, %159 : vector<8x128xf32>
    %161 = arith.negf %160 : vector<8x128xf32>
    %162 = math.exp %161 : vector<8x128xf32>
    %cst_36 = arith.constant 1.000000e+00 : f32
    %163 = vector.broadcast %cst_36 : f32 to vector<8x128xf32>
    %164 = arith.addf %163, %162 : vector<8x128xf32>
    %165 = arith.divf %163, %164 : vector<8x128xf32>
    %166 = vector.extract_strided_slice %165 {offsets = [0, 0], sizes = [8, 32], strides = [1, 1]} : vector<8x128xf32> to vector<8x32xf32>
    %167 = vector.extract_strided_slice %165 {offsets = [0, 32], sizes = [8, 32], strides = [1, 1]} : vector<8x128xf32> to vector<8x32xf32>
    %168 = vector.extract_strided_slice %165 {offsets = [0, 64], sizes = [8, 32], strides = [1, 1]} : vector<8x128xf32> to vector<8x32xf32>
    %cst_37 = arith.constant 2.000000e+00 : f32
    %169 = vector.broadcast %cst_37 : f32 to vector<8x32xf32>
    %170 = arith.mulf %169, %168 : vector<8x32xf32>
    %cst_38 = arith.constant 1.000000e+00 : f32
    %171 = vector.broadcast %cst_38 : f32 to vector<8x32xf32>
    %172 = arith.subf %170, %171 : vector<8x32xf32>
    %173 = vector.extract_strided_slice %165 {offsets = [0, 96], sizes = [8, 32], strides = [1, 1]} : vector<8x128xf32> to vector<8x32xf32>
    %174 = arith.mulf %167, %155 : vector<8x32xf32>
    %175 = arith.mulf %166, %172 : vector<8x32xf32>
    %176 = arith.addf %174, %175 : vector<8x32xf32>
    %177 = math.tanh %176 : vector<8x32xf32>
    %178 = arith.mulf %173, %177 : vector<8x32xf32>
    %c0_39 = arith.constant 0 : index
    %c0_40 = arith.constant 0 : index
    %179 = vector.load %arg3[%c0_39, %c0_40] : memref<32x128xf32, #tpu.memory_space<vmem>>, vector<32x128xf32>
    %cst_41 = arith.constant dense<0.000000e+00> : vector<8x128xf32>
    %180 = tpu.matmul %178, %179, %cst_41 {dimension_numbers = #tpu.dot_dimension_numbers<[1], [0], [0], [1], [0, 0, 1, 1], [], []>} : vector<8x32xf32>, vector<32x128xf32>, vector<8x128xf32> -> vector<8x128xf32>
    %c0_42 = arith.constant 0 : index
    %c0_43 = arith.constant 0 : index
    %181 = vector.load %arg4[%c0_42, %c0_43] : memref<8x128xf32, #tpu.memory_space<vmem>>, vector<8x128xf32>
    tpu.vector_store %arg4[%c0_42, %c0_43], %180 {strides = array<i32>} : memref<8x128xf32, #tpu.memory_space<vmem>>, vector<8x128xf32>,
    return
  }
}

</mosaic_0001>

<bundles_post_ra>
// kernel: vae_encoder_forward.1
= control target key start
LH: loop header
LB: loop body
LE: loop exit
PB: predicated region body
PF: predicated region fallthrough
CT: control target
= control target key end

     0   :  { %9 = vsyncpa [#allocation3], 0  ;;  %s823_s18 = smov [#allocation2]   ;;  %s824_s20 = smov 128   ;;  %s1008_s0 = inlined_call_operand.vmem [shape: s32[64,1], index: 0, kind: input, shape index: {}]   ;;  %s1009_s1 = inlined_call_operand.hbm [shape: f32[128,128], index: 1, kind: input, shape index: {}]   ;;  %s1010_s2 = inlined_call_operand.vmem [shape: f32[32,128], index: 2, kind: input, shape index: {}]   ;;  %s1011_s3 = inlined_call_operand.vmem [shape: f32[32,128], index: 3, kind: input, shape index: {}]   ;;  %s1012_s4 = inlined_call_operand.vmem [shape: f32[8,128], index: 4, kind: output, shape index: {}]  }
   0x1   :  { %s16_s17 = sshll.u32 %s1009_s1, 4  ;;  %s18_s19 = sshll.u32 %s823_s18, 4  ;;  %s17_s17 = int_to_ptr.hbm [resolvable:$true] %s16_s17  ;;  %s19_s19 = int_to_ptr.vmem [resolvable:$true] %s18_s19 }
   0x2   :  { %s825_s21 = smov 8  }
   0x3   :  { %24 = dma.hbm_to_vmem [thread:$0]  %s17_s17, 2048, %s19_s19, [#allocation3], %s824_s20, %s824_s20, %s825_s21  }
   0x4   :  { %821 = dma.done.wait [#allocation3], 2048  }
   0x5   :  { %822 = vsyncadd [#allocation3], 4294965248  ;;  %v826_v0 = vmov 0   ;;  %v33_v1 = vld [vmem:[%s1008_s0] sm:$0xff]  ;;  %v106_v2 = vld [vmem:[#allocation2 + $0x78] sm:$0xff]  ;;  %v827_v22 = vmov 0.0   ;;  %v41_v23 = vlaneseq }
   0x6   :  { %746 = vset.pattern.permute.xlu0 %v826_v0  ;;  %747 = vset.pattern.permute.xlu2 %v826_v0  ;;  %v105_v3 = vld [vmem:[#allocation2 + $0x70] sm:$0xff]  ;;  %v104_v4 = vld [vmem:[#allocation2 + $0x68] sm:$0xff]  ;;  %v103_v5 = vld [vmem:[#allocation2 + $0x60] sm:$0xff]  ;;  %v828_v26 = vmov 1.0   ;;  %s830_s5 = smov 32   ;;  %vm152_vm5 = vcmask 261120  }
   0x7   :  { %748 = vset.pattern.permute.xlu1 %v826_v0  ;;  %44 = vperm.xlu0 %746, %v33_v1   ;;  %v865_v6 = vld [vmem:[%s1010_s2 + $0x18] sm:$0xff]  ;;  %v871_v7 = vld [vmem:[%s1010_s2 + $0x10] sm:$0xff]  ;;  %v876_v9 = vld [vmem:[%s1010_s2 + $0x8] sm:$0xff]  ;;  %v910_v24 = vand.u32 127, %v41_v23 }
   0x8   :  { %107 = vmatpush.msra.mxu0 %v106_v2  ;;  %168 = vmatpush.msra.mxu1 %v865_v6  ;;  %v102_v8 = vld [vmem:[#allocation2 + $0x58] sm:$0xff]  ;;  %v101_v10 = vld [vmem:[#allocation2 + $0x50] sm:$0xff]  ;;  %v100_v11 = vld [vmem:[#allocation2 + $0x48] sm:$0xff] }
   0x9   :  { %232 = vmatpush.msra.mxu2 %v865_v6  ;;  %296 = vmatpush.msra.mxu3 %v865_v6  ;;  %v99_v12 = vld [vmem:[#allocation2 + $0x40] sm:$0xff]  ;;  %v98_v13 = vld [vmem:[#allocation2 + $0x38] sm:$0xff]  ;;  %v97_v14 = vld [vmem:[#allocation2 + $0x30] sm:$0xff] }
   0xa   :  { %108 = vmatpush.msra.mxu0 %v105_v3  ;;  %169 = vmatpush.msra.mxu1 %v871_v7  ;;  %v96_v15 = vld [vmem:[#allocation2 + $0x28] sm:$0xff]  ;;  %v95_v16 = vld [vmem:[#allocation2 + $0x20] sm:$0xff]  ;;  %v94_v17 = vld [vmem:[#allocation2 + $0x18] sm:$0xff] }
   0xb   :  { %233 = vmatpush.msra.mxu2 %v871_v7  ;;  %297 = vmatpush.msra.mxu3 %v871_v7  ;;  %v93_v18 = vld [vmem:[#allocation2 + $0x10] sm:$0xff]  ;;  %v92_v19 = vld [vmem:[#allocation2 + $0x8] sm:$0xff]  ;;  %v91_v20 = vld [vmem:[#allocation2] sm:$0xff] }
   0xc   :  { %109 = vmatpush.msra.mxu0 %v104_v4  ;;  %170 = vmatpush.msra.mxu1 %v876_v9  ;;  %v889_v21 = vld [vmem:[%s1010_s2] sm:$0xff]  ;;  %s829_s2 = smov 64   ;;  %v34_v53 = vld [vmem:[%s1008_s0 + $0x8] sm:$0xff] }
   0xd   :  { %234 = vmatpush.msra.mxu2 %v876_v9  ;;  %298 = vmatpush.msra.mxu3 %v876_v9 }
   0xe   :  { %110 = vmatpush.msra.mxu0 %v103_v5  ;;  %171 = vmatpush.msra.mxu1 %v889_v21 }
   0xf   :  { %172 = vmatmul.f32.vlgmr.msra.gmra.mxu1 %v827_v22  ;;  %235 = vmatpush.msra.mxu2 %v889_v21 }
  0x10   :  { %111 = vmatpush.msra.mxu0 %v102_v8  ;;  %299 = vmatpush.msra.mxu3 %v889_v21 }
  0x11   :  { %360 = vmatpush.msrb.mxu1 %v865_v6  ;;  %424 = vmatpush.msrb.mxu2 %v865_v6 }
  0x12   :  { %112 = vmatpush.msra.mxu0 %v101_v10  ;;  %488 = vmatpush.msrb.mxu3 %v865_v6 }
  0x13   :  { %361 = vmatpush.msrb.mxu1 %v871_v7  ;;  %425 = vmatpush.msrb.mxu2 %v871_v7 }
  0x14   :  { %113 = vmatpush.msra.mxu0 %v100_v11  ;;  %489 = vmatpush.msrb.mxu3 %v871_v7 }
  0x15   :  { %362 = vmatpush.msrb.mxu1 %v876_v9  ;;  %426 = vmatpush.msrb.mxu2 %v876_v9 }
  0x16   :  { %114 = vmatpush.msra.mxu0 %v99_v12  ;;  %490 = vmatpush.msrb.mxu3 %v876_v9 }
  0x17   :  { %363 = vmatpush.msrb.mxu1 %v889_v21  ;;  %427 = vmatpush.msrb.mxu2 %v889_v21 }
  0x18   :  { %115 = vmatpush.msra.mxu0 %v98_v13  ;;  %491 = vmatpush.msrb.mxu3 %v889_v21 }
  0x19   :  { %552 = vmatpush.msra.mxu1 %v865_v6 }
  0x1a   :  { %116 = vmatpush.msra.mxu0 %v97_v14 }
  0x1b   :  { %553 = vmatpush.msra.mxu1 %v871_v7 }
  0x1c   :  { %117 = vmatpush.msra.mxu0 %v96_v15 }
  0x1d   :  { %554 = vmatpush.msra.mxu1 %v876_v9 }
  0x1e   :  { %118 = vmatpush.msra.mxu0 %v95_v16  ;;  %v35_v16 = vld [vmem:[%s1008_s0 + $0x10] sm:$0xff] }
  0x1f   :  { %555 = vmatpush.msra.mxu1 %v889_v21 }
  0x20   :  { %119 = vmatpush.msra.mxu0 %v94_v17 }
  0x22   :  { %120 = vmatpush.msra.mxu0 %v93_v18 }
  0x24   :  { %121 = vmatpush.msra.mxu0 %v92_v19 }
  0x26   :  { %122 = vmatpush.msra.mxu0 %v91_v20 }
  0x79   :  { %v45_v25 = vpop.permute.xlu0 %44 }
  0x7a   :  { %vm67_vm0 = vcmp.eq.s32.totalorder %v910_v24, %v45_v25 }
  0x7b   :  { %706 = vmatmul.msk.f32.vlgmr.msra.gmra.mxu0 %vm67_vm0, %v828_v26 }
  0x8c   :  { %v173_v27 = vpop.f32.mrf.mxu1 }
  0xf8   :  { %v124_v28 = vpop.f32.mrf.mxu0 }
  0xf9   :  { %v176_v29 = vadd.f32 %v173_v27, %v124_v28 }
  0xfb   :  { %v714_v30 = vmul.f32 -1.442695, %v176_v29 }
  0xfd   :  { %749 = vpow2.f32 %v714_v30 }
 0x103   :  { %v750_v31 = vpop.eup %749 }
 0x104   :  { %v180_v32 = vadd.f32 1.0, %v750_v31 }
 0x106   :  { %751 = vrcp.f32 %v180_v32  ;;  %v192_v36 = vand.u32 2147483648, %v180_v32  ;;  %v190_v38 = vand.u32 2147483647, %v180_v32  ;;  %vm186_vm2 = vweird.f32 %v180_v32 }
 0x108   :  { %v193_v40 = vor.u32 1.1754944e-38, %v192_v36  ;;  %vm191_vm4 = vcmp.eq.f32.partialorder %v190_v38, 8.507059e+37 }
 0x10c   :  { %v752_v33 = vpop.eup %751 }
 0x10d   :  { %v182_v34 = vmul.f32 %v752_v33, %v180_v32  ;;  %vm187_vm1 = vweird.f32 %v752_v33 }
 0x10e   :  { %vm188_vm3 = vmor %vm186_vm2, %vm187_vm1 }
 0x10f   :  { %v183_v35 = vsub.f32 1.0, %v182_v34 }
 0x111   :  { %v184_v37 = vmul.f32 %v752_v33, %v183_v35 }
 0x113   :  { %v185_v39 = vadd.f32 %v752_v33, %v184_v37 }
 0x115   :  { %v189_v41 = vsel %vm188_vm3, %v752_v33, %v185_v39 }
 0x116   :  { %v194_v42 = vsel %vm191_vm4, %v193_v40, %v189_v41  ;;  %v36_v41 = vld [vmem:[%s1008_s0 + $0x18] sm:$0xff] }
 0x117   :  { %v196_v43 = vmul.f32 2.0, %v194_v42  ;;  %v198_v47 = vmul.f32 0.0, %v194_v42 }
 0x119   :  { %v715_v44 = vadd.f32 -1.0, %v196_v43 }
 0x11b   :  { %200 = vrot.lane.b32.xlu0 %v715_v44, %s829_s2 }
 0x18d   :  { %v201_v45 = vpop.permute.xlu0 %200 }
 0x18e   :  { %v203_v46 = vmul.f32 %v201_v45, %v194_v42 }
 0x190   :  { %205 = vrot.lane.b32.xlu1 %v203_v46, %s830_s5 }
 0x202   :  { %v206_v48 = vpop.permute.xlu1 %205 }
 0x203   :  { %v208_v49 = vadd.f32 %v206_v48, %v198_v47 }
 0x205   :  { %753 = vtanh.f32 %v208_v49 }
 0x20b   :  { %v754_v50 = vpop.eup %753 }
 0x20c   :  { %211 = vrot.lane.b32.xlu1 %v754_v50, %s829_s2 }
 0x27e   :  { %v212_v51 = vpop.permute.xlu1 %211 }
 0x27f   :  { %v214_v52 = vmul.f32 %v212_v51, %v194_v42 }
 0x281   :  { %216 = vrot.lane.b32.xlu2 %v214_v52, %s830_s5 }
 0x289   :  { %47 = vperm.xlu2 %747, %v34_v53  }
 0x2db   :  { %v217_v54 = vpop.permute.xlu2 %216 }
 0x2dc   :  { %716 = vmatmul.msk.f32.vlgmr.msra.gmra.mxu2 %vm152_vm5, %v217_v54 }
 0x2dd   :  { %616 = vmatpush.msra.mxu2 %v865_v6 }
 0x2df   :  { %617 = vmatpush.msra.mxu2 %v871_v7 }
 0x2e1   :  { %618 = vmatpush.msra.mxu2 %v876_v9 }
 0x2e3   :  { %v48_v55 = vpop.permute.xlu2 %47  ;;  %619 = vmatpush.msra.mxu2 %v889_v21 }
 0x2e4   :  { %vm68_vm6 = vcmp.eq.s32.totalorder %v910_v24, %v48_v55 }
 0x2e5   :  { %707 = vmatmul.msk.f32.gmra.mxu0 %vm68_vm6, %v828_v26 }
 0x35f   :  { %v237_v56 = vpop.f32.mrf.mxu2 }
 0x362   :  { %v127_v57 = vpop.f32.mrf.mxu0 }
 0x363   :  { %v240_v58 = vadd.f32 %v237_v56, %v127_v57 }
 0x365   :  { %v717_v59 = vmul.f32 -1.442695, %v240_v58 }
 0x367   :  { %755 = vpow2.f32 %v717_v59 }
 0x36d   :  { %v756_v60 = vpop.eup %755 }
 0x36e   :  { %v244_v61 = vadd.f32 1.0, %v756_v60 }
 0x370   :  { %757 = vrcp.f32 %v244_v61  ;;  %v256_v1 = vand.u32 2147483648, %v244_v61  ;;  %v254_v3 = vand.u32 2147483647, %v244_v61  ;;  %vm250_vm8 = vweird.f32 %v244_v61 }
 0x372   :  { %v257_v5 = vor.u32 1.1754944e-38, %v256_v1  ;;  %vm255_vm10 = vcmp.eq.f32.partialorder %v254_v3, 8.507059e+37 }
 0x376   :  { %v758_v62 = vpop.eup %757 }
 0x377   :  { %v246_v63 = vmul.f32 %v758_v62, %v244_v61  ;;  %vm251_vm7 = vweird.f32 %v758_v62 }
 0x378   :  { %vm252_vm9 = vmor %vm250_vm8, %vm251_vm7 }
 0x379   :  { %v247_v0 = vsub.f32 1.0, %v246_v63 }
 0x37b   :  { %v248_v2 = vmul.f32 %v758_v62, %v247_v0 }
 0x37d   :  { %v249_v4 = vadd.f32 %v758_v62, %v248_v2 }
 0x37f   :  { %v253_v6 = vsel %vm252_vm9, %v758_v62, %v249_v4 }
 0x380   :  { %v258_v7 = vsel %vm255_vm10, %v257_v5, %v253_v6 }
 0x381   :  { %v260_v8 = vmul.f32 2.0, %v258_v7  ;;  %v262_v12 = vmul.f32 %v258_v7, %v208_v49 }
 0x383   :  { %v718_v9 = vadd.f32 -1.0, %v260_v8  ;;  %v37_v8 = vld [vmem:[%s1008_s0 + $0x20] sm:$0xff] }
 0x385   :  { %264 = vrot.lane.b32.xlu0 %v718_v9, %s829_s2 }
 0x3f7   :  { %v265_v10 = vpop.permute.xlu0 %264 }
 0x3f8   :  { %v267_v11 = vmul.f32 %v265_v10, %v258_v7 }
 0x3fa   :  { %269 = vrot.lane.b32.xlu1 %v267_v11, %s830_s5 }
 0x402   :  { %50 = vperm.xlu1 %748, %v35_v16  }
 0x46c   :  { %v270_v13 = vpop.permute.xlu1 %269 }
 0x46d   :  { %v272_v14 = vadd.f32 %v270_v13, %v262_v12 }
 0x46f   :  { %759 = vtanh.f32 %v272_v14 }
 0x474   :  { %v51_v19 = vpop.permute.xlu1 %50 }
 0x475   :  { %v760_v15 = vpop.eup %759  ;;  %vm69_vm11 = vcmp.eq.s32.totalorder %v910_v24, %v51_v19 }
 0x476   :  { %275 = vrot.lane.b32.xlu2 %v760_v15, %s829_s2  ;;  %708 = vmatmul.msk.f32.gmra.mxu0 %vm69_vm11, %v828_v26 }
 0x4d0   :  { %v276_v17 = vpop.permute.xlu2 %275 }
 0x4d1   :  { %v278_v18 = vmul.f32 %v276_v17, %v258_v7 }
 0x4d3   :  { %280 = vrot.lane.b32.xlu0 %v278_v18, %s830_s5 }
 0x4f3   :  { %v130_v21 = vpop.f32.mrf.mxu0 }
 0x545   :  { %v281_v20 = vpop.permute.xlu0 %280 }
 0x546   :  { %719 = vmatmul.msk.f32.vlgmr.msra.gmra.mxu3 %vm152_vm5, %v281_v20 }
 0x5c9   :  { %v301_v22 = vpop.f32.mrf.mxu3 }
 0x5ca   :  { %v304_v23 = vadd.f32 %v301_v22, %v130_v21 }
 0x5cc   :  { %v720_v25 = vmul.f32 -1.442695, %v304_v23 }
 0x5ce   :  { %761 = vpow2.f32 %v720_v25 }
 0x5d4   :  { %v762_v27 = vpop.eup %761 }
 0x5d5   :  { %v308_v28 = vadd.f32 1.0, %v762_v27 }
 0x5d7   :  { %763 = vrcp.f32 %v308_v28  ;;  %v320_v32 = vand.u32 2147483648, %v308_v28  ;;  %v318_v34 = vand.u32 2147483647, %v308_v28  ;;  %vm314_vm13 = vweird.f32 %v308_v28 }
 0x5d9   :  { %v321_v36 = vor.u32 1.1754944e-38, %v320_v32  ;;  %vm319_vm15 = vcmp.eq.f32.partialorder %v318_v34, 8.507059e+37 }
 0x5dd   :  { %v764_v29 = vpop.eup %763 }
 0x5de   :  { %v310_v30 = vmul.f32 %v764_v29, %v308_v28  ;;  %vm315_vm12 = vweird.f32 %v764_v29 }
 0x5df   :  { %vm316_vm14 = vmor %vm314_vm13, %vm315_vm12 }
 0x5e0   :  { %v311_v31 = vsub.f32 1.0, %v310_v30 }
 0x5e2   :  { %v312_v33 = vmul.f32 %v764_v29, %v311_v31 }
 0x5e4   :  { %v313_v35 = vadd.f32 %v764_v29, %v312_v33 }
 0x5e6   :  { %v317_v37 = vsel %vm316_vm14, %v764_v29, %v313_v35 }
 0x5e7   :  { %v322_v38 = vsel %vm319_vm15, %v321_v36, %v317_v37 }
 0x5e8   :  { %v324_v39 = vmul.f32 2.0, %v322_v38  ;;  %v326_v45 = vmul.f32 %v322_v38, %v272_v14 }
 0x5ea   :  { %v721_v40 = vadd.f32 -1.0, %v324_v39  ;;  %v38_v39 = vld [vmem:[%s1008_s0 + $0x28] sm:$0xff] }
 0x5ec   :  { %328 = vrot.lane.b32.xlu2 %v721_v40, %s829_s2 }
 0x5f4   :  { %53 = vperm.xlu2 %747, %v36_v41  }
 0x646   :  { %v329_v42 = vpop.permute.xlu2 %328 }
 0x647   :  { %v331_v43 = vmul.f32 %v329_v42, %v322_v38 }
 0x649   :  { %333 = vrot.lane.b32.xlu0 %v331_v43, %s830_s5 }
 0x64e   :  { %v54_v44 = vpop.permute.xlu2 %53 }
 0x64f   :  { %vm70_vm0 = vcmp.eq.s32.totalorder %v910_v24, %v54_v44 }
 0x650   :  { %709 = vmatmul.msk.f32.gmra.mxu0 %vm70_vm0, %v828_v26 }
 0x6bb   :  { %v334_v46 = vpop.permute.xlu0 %333 }
 0x6bc   :  { %v336_v47 = vadd.f32 %v334_v46, %v326_v45 }
 0x6be   :  { %765 = vtanh.f32 %v336_v47 }
 0x6c4   :  { %v766_v48 = vpop.eup %765 }
 0x6c5   :  { %339 = vrot.lane.b32.xlu1 %v766_v48, %s829_s2 }
 0x6cd   :  { %v133_v52 = vpop.f32.mrf.mxu0 }
 0x737   :  { %v340_v49 = vpop.permute.xlu1 %339 }
 0x738   :  { %v342_v50 = vmul.f32 %v340_v49, %v322_v38 }
 0x73a   :  { %344 = vrot.lane.b32.xlu0 %v342_v50, %s830_s5 }
 0x7ac   :  { %v345_v51 = vpop.permute.xlu0 %344 }
 0x7ad   :  { %722 = vmatmul.msk.f32.vlgmr.msrb.gmra.mxu1 %vm152_vm5, %v345_v51 }
 0x82a   :  { %v365_v53 = vpop.f32.mrf.mxu1 }
 0x82b   :  { %v368_v54 = vadd.f32 %v365_v53, %v133_v52 }
 0x82d   :  { %v723_v55 = vmul.f32 -1.442695, %v368_v54 }
 0x82f   :  { %767 = vpow2.f32 %v723_v55 }
 0x835   :  { %v768_v56 = vpop.eup %767 }
 0x836   :  { %v372_v57 = vadd.f32 1.0, %v768_v56 }
 0x838   :  { %769 = vrcp.f32 %v372_v57  ;;  %v384_v61 = vand.u32 2147483648, %v372_v57  ;;  %v382_v63 = vand.u32 2147483647, %v372_v57  ;;  %vm378_vm2 = vweird.f32 %v372_v57 }
 0x83a   :  { %v385_v1 = vor.u32 1.1754944e-38, %v384_v61  ;;  %vm383_vm4 = vcmp.eq.f32.partialorder %v382_v63, 8.507059e+37 }
 0x83e   :  { %v770_v58 = vpop.eup %769 }
 0x83f   :  { %v374_v59 = vmul.f32 %v770_v58, %v372_v57  ;;  %vm379_vm1 = vweird.f32 %v770_v58 }
 0x840   :  { %vm380_vm3 = vmor %vm378_vm2, %vm379_vm1 }
 0x841   :  { %v375_v60 = vsub.f32 1.0, %v374_v59 }
 0x843   :  { %v376_v62 = vmul.f32 %v770_v58, %v375_v60 }
 0x845   :  { %v377_v0 = vadd.f32 %v770_v58, %v376_v62 }
 0x847   :  { %v381_v2 = vsel %vm380_vm3, %v770_v58, %v377_v0 }
 0x848   :  { %v386_v3 = vsel %vm383_vm4, %v385_v1, %v381_v2  ;;  %v39_v2 = vld [vmem:[%s1008_s0 + $0x30] sm:$0xff] }
 0x849   :  { %v388_v4 = vmul.f32 2.0, %v386_v3  ;;  %v390_v9 = vmul.f32 %v386_v3, %v336_v47 }
 0x84b   :  { %v724_v5 = vadd.f32 -1.0, %v388_v4 }
 0x84d   :  { %392 = vrot.lane.b32.xlu1 %v724_v5, %s829_s2 }
 0x8bf   :  { %v393_v6 = vpop.permute.xlu1 %392 }
 0x8c0   :  { %v395_v7 = vmul.f32 %v393_v6, %v386_v3 }
 0x8c2   :  { %397 = vrot.lane.b32.xlu2 %v395_v7, %s830_s5 }
 0x8ca   :  { %56 = vperm.xlu2 %747, %v37_v8  }
 0x91c   :  { %v398_v10 = vpop.permute.xlu2 %397 }
 0x91d   :  { %v400_v11 = vadd.f32 %v398_v10, %v390_v9 }
 0x91f   :  { %771 = vtanh.f32 %v400_v11 }
 0x924   :  { %v57_v12 = vpop.permute.xlu2 %56 }
 0x925   :  { %v772_v13 = vpop.eup %771  ;;  %vm71_vm6 = vcmp.eq.s32.totalorder %v910_v24, %v57_v12 }
 0x926   :  { %403 = vrot.lane.b32.xlu0 %v772_v13, %s829_s2  ;;  %710 = vmatmul.msk.f32.gmra.mxu0 %vm71_vm6, %v828_v26 }
 0x998   :  { %v404_v14 = vpop.permute.xlu0 %403 }
 0x999   :  { %v406_v15 = vmul.f32 %v404_v14, %v386_v3 }
 0x99b   :  { %408 = vrot.lane.b32.xlu1 %v406_v15, %s830_s5 }
 0x9a3   :  { %v136_v17 = vpop.f32.mrf.mxu0 }
 0xa0d   :  { %v409_v16 = vpop.permute.xlu1 %408 }
 0xa0e   :  { %725 = vmatmul.msk.f32.vlgmr.msrb.gmra.mxu2 %vm152_vm5, %v409_v16 }
 0xa91   :  { %v429_v18 = vpop.f32.mrf.mxu2 }
 0xa92   :  { %v432_v19 = vadd.f32 %v429_v18, %v136_v17 }
 0xa94   :  { %v726_v20 = vmul.f32 -1.442695, %v432_v19 }
 0xa96   :  { %773 = vpow2.f32 %v726_v20 }
 0xa9c   :  { %v774_v21 = vpop.eup %773 }
 0xa9d   :  { %v436_v22 = vadd.f32 1.0, %v774_v21 }
 0xa9f   :  { %775 = vrcp.f32 %v436_v22  ;;  %v448_v28 = vand.u32 2147483648, %v436_v22  ;;  %v446_v30 = vand.u32 2147483647, %v436_v22  ;;  %vm442_vm8 = vweird.f32 %v436_v22 }
 0xaa1   :  { %v449_v32 = vor.u32 1.1754944e-38, %v448_v28  ;;  %vm447_vm10 = vcmp.eq.f32.partialorder %v446_v30, 8.507059e+37 }
 0xaa5   :  { %v776_v23 = vpop.eup %775 }
 0xaa6   :  { %v438_v25 = vmul.f32 %v776_v23, %v436_v22  ;;  %vm443_vm7 = vweird.f32 %v776_v23 }
 0xaa7   :  { %vm444_vm9 = vmor %vm442_vm8, %vm443_vm7 }
 0xaa8   :  { %v439_v27 = vsub.f32 1.0, %v438_v25 }
 0xaaa   :  { %v440_v29 = vmul.f32 %v776_v23, %v439_v27 }
 0xaac   :  { %v441_v31 = vadd.f32 %v776_v23, %v440_v29 }
 0xaae   :  { %v445_v33 = vsel %vm444_vm9, %v776_v23, %v441_v31 }
 0xaaf   :  { %v450_v34 = vsel %vm447_vm10, %v449_v32, %v445_v33 }
 0xab0   :  { %v452_v35 = vmul.f32 2.0, %v450_v34  ;;  %v454_v40 = vmul.f32 %v450_v34, %v400_v11 }
 0xab2   :  { %v727_v36 = vadd.f32 -1.0, %v452_v35  ;;  %v40_v35 = vld [vmem:[%s1008_s0 + $0x38] sm:$0xff] }
 0xab4   :  { %456 = vrot.lane.b32.xlu0 %v727_v36, %s829_s2 }
 0xb26   :  { %v457_v37 = vpop.permute.xlu0 %456 }
 0xb27   :  { %v459_v38 = vmul.f32 %v457_v37, %v450_v34 }
 0xb29   :  { %461 = vrot.lane.b32.xlu1 %v459_v38, %s830_s5 }
 0xb31   :  { %59 = vperm.xlu1 %748, %v38_v39  }
 0xb9b   :  { %v462_v41 = vpop.permute.xlu1 %461 }
 0xb9c   :  { %v464_v42 = vadd.f32 %v462_v41, %v454_v40 }
 0xb9e   :  { %777 = vtanh.f32 %v464_v42 }
 0xba3   :  { %v60_v43 = vpop.permute.xlu1 %59 }
 0xba4   :  { %v778_v44 = vpop.eup %777  ;;  %vm72_vm11 = vcmp.eq.s32.totalorder %v910_v24, %v60_v43 }
 0xba5   :  { %467 = vrot.lane.b32.xlu2 %v778_v44, %s829_s2  ;;  %711 = vmatmul.msk.f32.gmra.mxu0 %vm72_vm11, %v828_v26 }
 0xbff   :  { %v468_v45 = vpop.permute.xlu2 %467 }
 0xc00   :  { %v470_v46 = vmul.f32 %v468_v45, %v450_v34 }
 0xc02   :  { %472 = vrot.lane.b32.xlu0 %v470_v46, %s830_s5 }
 0xc22   :  { %v139_v48 = vpop.f32.mrf.mxu0 }
 0xc74   :  { %v473_v47 = vpop.permute.xlu0 %472 }
 0xc75   :  { %728 = vmatmul.msk.f32.vlgmr.msrb.gmra.mxu3 %vm152_vm5, %v473_v47 }
 0xcf8   :  { %v493_v49 = vpop.f32.mrf.mxu3 }
 0xcf9   :  { %v496_v50 = vadd.f32 %v493_v49, %v139_v48 }
 0xcfb   :  { %v729_v51 = vmul.f32 -1.442695, %v496_v50 }
 0xcfd   :  { %779 = vpow2.f32 %v729_v51 }
 0xd03   :  { %v780_v52 = vpop.eup %779 }
 0xd04   :  { %v500_v53 = vadd.f32 1.0, %v780_v52 }
 0xd06   :  { %781 = vrcp.f32 %v500_v53  ;;  %v512_v57 = vand.u32 2147483648, %v500_v53  ;;  %v510_v59 = vand.u32 2147483647, %v500_v53  ;;  %vm506_vm13 = vweird.f32 %v500_v53 }
 0xd08   :  { %v513_v61 = vor.u32 1.1754944e-38, %v512_v57  ;;  %vm511_vm15 = vcmp.eq.f32.partialorder %v510_v59, 8.507059e+37 }
 0xd0c   :  { %v782_v54 = vpop.eup %781 }
 0xd0d   :  { %v502_v55 = vmul.f32 %v782_v54, %v500_v53  ;;  %vm507_vm12 = vweird.f32 %v782_v54 }
 0xd0e   :  { %vm508_vm14 = vmor %vm506_vm13, %vm507_vm12 }
 0xd0f   :  { %v503_v56 = vsub.f32 1.0, %v502_v55 }
 0xd11   :  { %v504_v58 = vmul.f32 %v782_v54, %v503_v56 }
 0xd13   :  { %v505_v60 = vadd.f32 %v782_v54, %v504_v58 }
 0xd15   :  { %v509_v62 = vsel %vm508_vm14, %v782_v54, %v505_v60 }
 0xd16   :  { %v514_v63 = vsel %vm511_vm15, %v513_v61, %v509_v62 }
 0xd17   :  { %v516_v0 = vmul.f32 2.0, %v514_v63  ;;  %v518_v6 = vmul.f32 %v514_v63, %v464_v42 }
 0xd19   :  { %v730_v1 = vadd.f32 -1.0, %v516_v0 }
 0xd1b   :  { %520 = vrot.lane.b32.xlu2 %v730_v1, %s829_s2 }
 0xd23   :  { %62 = vperm.xlu2 %747, %v39_v2   ;;  %v666_v2 = vld [vmem:[%s1011_s3 + $0x18] sm:$0xff] }
 0xd24   :  { %684 = vmatpush.msra.mxu3 %v666_v2 }
 0xd75   :  { %v521_v3 = vpop.permute.xlu2 %520 }
 0xd76   :  { %v523_v4 = vmul.f32 %v521_v3, %v514_v63  ;;  %v665_v3 = vld [vmem:[%s1011_s3 + $0x10] sm:$0xff] }
 0xd77   :  { %685 = vmatpush.msra.mxu3 %v665_v3 }
 0xd78   :  { %525 = vrot.lane.b32.xlu0 %v523_v4, %s830_s5  ;;  %v664_v4 = vld [vmem:[%s1011_s3 + $0x8] sm:$0xff] }
 0xd79   :  { %686 = vmatpush.msra.mxu3 %v664_v4 }
 0xd7d   :  { %v63_v5 = vpop.permute.xlu2 %62 }
 0xd7e   :  { %vm73_vm0 = vcmp.eq.s32.totalorder %v910_v24, %v63_v5  ;;  %v663_v5 = vld [vmem:[%s1011_s3] sm:$0xff] }
 0xd7f   :  { %712 = vmatmul.msk.f32.gmra.mxu0 %vm73_vm0, %v828_v26  ;;  %687 = vmatpush.msra.mxu3 %v663_v5 }
 0xdea   :  { %v526_v7 = vpop.permute.xlu0 %525 }
 0xdeb   :  { %v528_v8 = vadd.f32 %v526_v7, %v518_v6 }
 0xded   :  { %783 = vtanh.f32 %v528_v8 }
 0xdf3   :  { %v784_v9 = vpop.eup %783 }
 0xdf4   :  { %531 = vrot.lane.b32.xlu1 %v784_v9, %s829_s2 }
 0xdfc   :  { %v142_v13 = vpop.f32.mrf.mxu0 }
 0xe66   :  { %v532_v10 = vpop.permute.xlu1 %531 }
 0xe67   :  { %v534_v11 = vmul.f32 %v532_v10, %v514_v63 }
 0xe69   :  { %536 = vrot.lane.b32.xlu0 %v534_v11, %s830_s5 }
 0xedb   :  { %v537_v12 = vpop.permute.xlu0 %536 }
 0xedc   :  { %731 = vmatmul.msk.f32.vlgmr.msra.gmra.mxu1 %vm152_vm5, %v537_v12 }
 0xf59   :  { %v557_v14 = vpop.f32.mrf.mxu1 }
 0xf5a   :  { %v560_v15 = vadd.f32 %v557_v14, %v142_v13 }
 0xf5c   :  { %v732_v16 = vmul.f32 -1.442695, %v560_v15 }
 0xf5e   :  { %785 = vpow2.f32 %v732_v16 }
 0xf64   :  { %v786_v17 = vpop.eup %785 }
 0xf65   :  { %v564_v18 = vadd.f32 1.0, %v786_v17 }
 0xf67   :  { %787 = vrcp.f32 %v564_v18  ;;  %v576_v22 = vand.u32 2147483648, %v564_v18  ;;  %v574_v25 = vand.u32 2147483647, %v564_v18  ;;  %vm570_vm2 = vweird.f32 %v564_v18 }
 0xf69   :  { %v577_v28 = vor.u32 1.1754944e-38, %v576_v22  ;;  %vm575_vm4 = vcmp.eq.f32.partialorder %v574_v25, 8.507059e+37 }
 0xf6d   :  { %v788_v19 = vpop.eup %787 }
 0xf6e   :  { %v566_v20 = vmul.f32 %v788_v19, %v564_v18  ;;  %vm571_vm1 = vweird.f32 %v788_v19 }
 0xf6f   :  { %vm572_vm3 = vmor %vm570_vm2, %vm571_vm1 }
 0xf70   :  { %v567_v21 = vsub.f32 1.0, %v566_v20 }
 0xf72   :  { %v568_v23 = vmul.f32 %v788_v19, %v567_v21 }
 0xf74   :  { %v569_v27 = vadd.f32 %v788_v19, %v568_v23 }
 0xf76   :  { %v573_v29 = vsel %vm572_vm3, %v788_v19, %v569_v27 }
 0xf77   :  { %v578_v30 = vsel %vm575_vm4, %v577_v28, %v573_v29 }
 0xf78   :  { %v580_v31 = vmul.f32 2.0, %v578_v30  ;;  %v582_v36 = vmul.f32 %v578_v30, %v528_v8 }
 0xf7a   :  { %v733_v32 = vadd.f32 -1.0, %v580_v31 }
 0xf7c   :  { %584 = vrot.lane.b32.xlu1 %v733_v32, %s829_s2 }
 0xfee   :  { %v585_v33 = vpop.permute.xlu1 %584 }
 0xfef   :  { %v587_v34 = vmul.f32 %v585_v33, %v578_v30 }
 0xff1   :  { %589 = vrot.lane.b32.xlu2 %v587_v34, %s830_s5 }
 0xff9   :  { %65 = vperm.xlu2 %747, %v40_v35  }
0x104b   :  { %v590_v37 = vpop.permute.xlu2 %589 }
0x104c   :  { %v592_v38 = vadd.f32 %v590_v37, %v582_v36 }
0x104e   :  { %789 = vtanh.f32 %v592_v38 }
0x1053   :  { %v66_v39 = vpop.permute.xlu2 %65 }
0x1054   :  { %v790_v40 = vpop.eup %789  ;;  %vm74_vm6 = vcmp.eq.s32.totalorder %v910_v24, %v66_v39 }
0x1055   :  { %595 = vrot.lane.b32.xlu0 %v790_v40, %s829_s2  ;;  %713 = vmatmul.msk.f32.gmra.mxu0 %vm74_vm6, %v828_v26 }
0x10c7   :  { %v596_v41 = vpop.permute.xlu0 %595 }
0x10c8   :  { %v598_v42 = vmul.f32 %v596_v41, %v578_v30 }
0x10ca   :  { %600 = vrot.lane.b32.xlu1 %v598_v42, %s830_s5 }
0x10d2   :  { %v145_v44 = vpop.f32.mrf.mxu0 }
0x113c   :  { %v601_v43 = vpop.permute.xlu1 %600 }
0x113d   :  { %734 = vmatmul.msk.f32.vlgmr.msra.gmra.mxu2 %vm152_vm5, %v601_v43 }
0x11c0   :  { %v621_v45 = vpop.f32.mrf.mxu2 }
0x11c1   :  { %v624_v46 = vadd.f32 %v621_v45, %v145_v44 }
0x11c3   :  { %v735_v47 = vmul.f32 -1.442695, %v624_v46 }
0x11c5   :  { %791 = vpow2.f32 %v735_v47 }
0x11cb   :  { %v792_v48 = vpop.eup %791 }
0x11cc   :  { %v628_v49 = vadd.f32 1.0, %v792_v48 }
0x11ce   :  { %793 = vrcp.f32 %v628_v49  ;;  %v640_v52 = vand.u32 2147483648, %v628_v49  ;;  %v638_v53 = vand.u32 2147483647, %v628_v49  ;;  %vm634_vm8 = vweird.f32 %v628_v49 }
0x11d0   :  { %v641_v55 = vor.u32 1.1754944e-38, %v640_v52  ;;  %vm639_vm10 = vcmp.eq.f32.partialorder %v638_v53, 8.507059e+37 }
0x11d4   :  { %v794_v24 = vpop.eup %793 }
0x11d5   :  { %v630_v50 = vmul.f32 %v794_v24, %v628_v49  ;;  %vm635_vm7 = vweird.f32 %v794_v24 }
0x11d6   :  { %vm636_vm9 = vmor %vm634_vm8, %vm635_vm7 }
0x11d7   :  { %v631_v51 = vsub.f32 1.0, %v630_v50 }
0x11d9   :  { %v632_v26 = vmul.f32 %v794_v24, %v631_v51 }
0x11db   :  { %v633_v54 = vadd.f32 %v794_v24, %v632_v26 }
0x11dd   :  { %v637_v56 = vsel %vm636_vm9, %v794_v24, %v633_v54 }
0x11de   :  { %v642_v57 = vsel %vm639_vm10, %v641_v55, %v637_v56 }
0x11df   :  { %v644_v58 = vmul.f32 2.0, %v642_v57  ;;  %v646_v62 = vmul.f32 %v642_v57, %v592_v38 }
0x11e1   :  { %v736_v59 = vadd.f32 -1.0, %v644_v58 }
0x11e3   :  { %648 = vrot.lane.b32.xlu0 %v736_v59, %s829_s2 }
0x1255   :  { %v649_v60 = vpop.permute.xlu0 %648 }
0x1256   :  { %v651_v61 = vmul.f32 %v649_v60, %v642_v57 }
0x1258   :  { %653 = vrot.lane.b32.xlu1 %v651_v61, %s830_s5 }
0x12ca   :  { %v654_v63 = vpop.permute.xlu1 %653 }
0x12cb   :  { %v656_v0 = vadd.f32 %v654_v63, %v646_v62 }
0x12cd   :  { %795 = vtanh.f32 %v656_v0 }
0x12d3   :  { %v796_v1 = vpop.eup %795 }
0x12d4   :  { %659 = vrot.lane.b32.xlu2 %v796_v1, %s829_s2 }
0x132e   :  { %v660_v6 = vpop.permute.xlu2 %659 }
0x132f   :  { %v662_v7 = vmul.f32 %v660_v6, %v642_v57 }
0x1331   :  { %668 = vrot.lane.b32.xlu0 %v662_v7, %s830_s5 }
0x13a3   :  { %v669_v8 = vpop.permute.xlu0 %668 }
0x13a4   :  { %737 = vmatmul.msk.f32.vlgmr.msra.gmra.mxu3 %vm152_vm5, %v669_v8 }
0x1427   :  { %v689_v9 = vpop.f32.mrf.mxu3 }
0x1428   :  { %692 = vst [vmem:[%s1012_s4] sm:$0xff] %v689_v9 }
0x1429   :  { %697 = vsyncpa [#allocation3], 1 }

</bundles_post_ra>
